<compile_context>
chip_gen: v6e
topology: v6e:2x2x1
jax: 0.10.0
libtpu: 0.0.40
codegen_flags: <defaults>
</compile_context>

<pallas_src>
import functools

import jax
import jax.numpy as jnp
from jax.experimental import pallas as pl
from jax.experimental.pallas import tpu as pltpu


def vae_forward_kernel(
    x_ref, eps_ref,
    w1_ref, b1_ref,
    wh_ref, bh_ref,          # fused heads: (D_in, 2R), (1, 2R)  ->  [mu | logvar]
    w3_ref, b3_ref,
    w4_ref, b4_ref,
    out_ref,                 # packed (TB, D_out + 3R): [recon | z | mu | logvar]
    *, rep_size, mxu_dtype,
):
    R = rep_size

    x = x_ref[...].astype(mxu_dtype)

    # encode: h1 = relu(fc1(x))
    h1 = jnp.dot(x, w1_ref[...], preferred_element_type=jnp.float32) + b1_ref[...]
    h1 = jnp.maximum(h1, 0.0)

    # fused mu/logvar heads: one MXU pass over (D_in, 2R)
    heads = (jnp.dot(h1.astype(mxu_dtype), wh_ref[...],
                     preferred_element_type=jnp.float32) + bh_ref[...])
    mu = heads[:, :R]
    logvar = heads[:, R:]

    # reparameterize (training mode): z = eps * exp(0.5 * logvar) + mu  (f32 VPU/EUP)
    std = jnp.exp(0.5 * logvar)
    z = eps_ref[...] * std + mu

    # decode: sigmoid(fc4(relu(fc3(z))))
    h3 = jnp.dot(z.astype(mxu_dtype), w3_ref[...],
                 preferred_element_type=jnp.float32) + b3_ref[...]
    h3 = jnp.maximum(h3, 0.0)
    logits = jnp.dot(h3.astype(mxu_dtype), w4_ref[...],
                     preferred_element_type=jnp.float32) + b4_ref[...]
    recon = jax.nn.sigmoid(logits)

    # single lane-dense store per grid step
    packed = jnp.concatenate([recon, z, mu, logvar], axis=-1)
    out_ref[...] = packed.astype(out_ref.dtype)


def _pick_tb(batch, tb):
    """Pick a batch tile that satisfies the (8,128) sublane rule and divides B."""
    if tb is None:
        tb = min(batch, 256)
    tb = min(tb, batch)
    if batch % tb != 0 or (tb != batch and tb % 8 != 0):
        tb = batch
    return tb


def mnist_vae_forward(x, eps, params, *, tb=None, use_bf16_mxu=False):
    """x: (B, input_size) f32; eps: (B, representation_size) f32.

    Returns (recon, z, mu, logvar), each f32.
    """
    B, D_in = x.shape
    R = params["w21"].shape[1]
    D_out = params["w4"].shape[1]
    D_pack = D_out + 3 * R

    tb = _pick_tb(B, tb)
    grid = (pl.cdiv(B, tb),)

    mxu_dtype = jnp.bfloat16 if use_bf16_mxu else jnp.float32

    # Fuse mu/logvar heads once in the wrapper.
    w_heads = jnp.concatenate([params["w21"], params["w22"]], axis=1)
    b_heads = jnp.concatenate([params["b21"], params["b22"]], axis=1)

    def wcast(w):
        return w.astype(mxu_dtype)

    weights = (
        wcast(params["w1"]), params["b1"],
        wcast(w_heads), b_heads,
        wcast(params["w3"]), params["b3"],
        wcast(params["w4"]), params["b4"],
    )

    # Batch-tiled inputs / outputs; weights resident across all grid steps.
    batch_spec = lambda d: pl.BlockSpec((tb, d), lambda i: (i, 0))
    resident_spec = lambda a: pl.BlockSpec(a.shape, lambda i: (0, 0))

    in_specs = [batch_spec(D_in), batch_spec(R)] + [resident_spec(w) for w in weights]
    out_spec = pl.BlockSpec((tb, D_pack), lambda i: (i, 0))

    # Advisory cost estimate (helps XLA schedule around this custom call).
    flops = 2 * B * (D_in * D_in + D_in * 2 * R + R * D_out + D_out * D_out)
    transcendentals = B * (R + D_out)            # exp(0.5*logvar) + sigmoid
    weight_bytes = sum(int(w.size) * w.dtype.itemsize for w in weights)
    bytes_accessed = int(x.nbytes + eps.nbytes + weight_bytes + B * D_pack * 4)

    kernel = functools.partial(vae_forward_kernel, rep_size=R, mxu_dtype=mxu_dtype)

    packed = pl.pallas_call(
        kernel,
        out_shape=jax.ShapeDtypeStruct((B, D_pack), jnp.float32),
        grid=grid,
        in_specs=in_specs,
        out_specs=out_spec,
        compiler_params=pltpu.CompilerParams(
            dimension_semantics=("parallel",),
        ),
        cost_estimate=pl.CostEstimate(
            flops=flops,
            transcendentals=transcendentals,
            bytes_accessed=bytes_accessed,
        ),
    )(x, eps, *weights)

    recon = packed[:, :D_out]
    z = packed[:, D_out:D_out + R]
    mu = packed[:, D_out + R:D_out + 2 * R]
    logvar = packed[:, D_out + 2 * R:]
    return recon, z, mu, logvar


def init_params(key, input_size, output_size, representation_size):
    """Deterministic PyTorch-Linear-style init (uniform ±1/sqrt(fan_in)).
    Weights stored as (in_features, out_features)."""
    def linear(k, fan_in, fan_out):
        kw, kb = jax.random.split(k)
        bound = 1.0 / jnp.sqrt(jnp.float32(fan_in))
        w = jax.random.uniform(kw, (fan_in, fan_out), jnp.float32, -bound, bound)
        b = jax.random.uniform(kb, (1, fan_out), jnp.float32, -bound, bound)
        return w, b

    k1, k21, k22, k3, k4 = jax.random.split(key, 5)
    w1, b1 = linear(k1, input_size, input_size)
    w21, b21 = linear(k21, input_size, representation_size)
    w22, b22 = linear(k22, input_size, representation_size)
    w3, b3 = linear(k3, representation_size, output_size)
    w4, b4 = linear(k4, output_size, output_size)
    return dict(w1=w1, b1=b1, w21=w21, b21=b21, w22=w22, b22=b22,
                w3=w3, b3=b3, w4=w4, b4=b4)


def reference_forward(x, eps, p):
    """Pure-JAX reference (matches the PyTorch forward in training mode)."""
    h1 = jnp.maximum(x @ p["w1"] + p["b1"], 0.0)
    mu = h1 @ p["w21"] + p["b21"]
    logvar = h1 @ p["w22"] + p["b22"]
    z = eps * jnp.exp(0.5 * logvar) + mu
    h3 = jnp.maximum(z @ p["w3"] + p["b3"], 0.0)
    recon = jax.nn.sigmoid(h3 @ p["w4"] + p["b4"])
    return recon, z, mu, logvar


if __name__ == "__main__":
    # Small shapes consistent with the module: batch=16, input/output=32, rep=8.
    # TB=8 exercises the batch grid (2 steps) while respecting the sublane rule.
    # NOTE: at production MNIST-VAE sizes (784/400/20) use tb>=128 (up to 512)
    # and use_bf16_mxu=True on v6e/v7x for real benefit.
    B, INPUT_SIZE, OUTPUT_SIZE, REP_SIZE = 16, 32, 32, 8

    key = jax.random.PRNGKey(0)
    k_x, k_eps, k_p = jax.random.split(key, 3)

    # forward() does x.view(-1, input_size); we supply x already flattened.
    x = jax.random.normal(k_x, (B, INPUT_SIZE), jnp.float32)
    eps = jax.random.normal(k_eps, (B, REP_SIZE), jnp.float32)
    params = init_params(k_p, INPUT_SIZE, OUTPUT_SIZE, REP_SIZE)

    recon, z, mu, logvar = jax.block_until_ready(
        mnist_vae_forward(x, eps, params, tb=8)
    )

    # Correctness check against plain-JAX reference (f32 MXU path).
    r_ref, z_ref, mu_ref, lv_ref = reference_forward(x, eps, params)
    assert jnp.allclose(recon, r_ref, atol=1e-5, rtol=1e-5)
    assert jnp.allclose(z, z_ref, atol=1e-5, rtol=1e-5)
    assert jnp.allclose(mu, mu_ref, atol=1e-5, rtol=1e-5)
    assert jnp.allclose(logvar, lv_ref, atol=1e-5, rtol=1e-5)

    print("KERNEL_OK")
</pallas_src>

<mosaic_0001>
module attributes {stable_mosaic.version = 11 : i64} {
  func.func @vae_forward_kernel(%arg0: i32, %arg1: memref<8x32xf32, #tpu.memory_space<vmem>>, %arg2: memref<8x8xf32, #tpu.memory_space<vmem>>, %arg3: memref<32x32xf32, #tpu.memory_space<vmem>>, %arg4: memref<1x32xf32, #tpu.memory_space<vmem>>, %arg5: memref<32x16xf32, #tpu.memory_space<vmem>>, %arg6: memref<1x16xf32, #tpu.memory_space<vmem>>, %arg7: memref<8x32xf32, #tpu.memory_space<vmem>>, %arg8: memref<1x32xf32, #tpu.memory_space<vmem>>, %arg9: memref<32x32xf32, #tpu.memory_space<vmem>>, %arg10: memref<1x32xf32, #tpu.memory_space<vmem>>, %arg11: memref<8x56xf32, #tpu.memory_space<vmem>>) attributes {dimension_semantics = [#tpu.dimension_semantics<parallel>], iteration_bounds = array<i64: 2>, scalar_prefetch = 0 : i64, scratch_operands = 0 : i64, tpu.core_type = #tpu.core_type<tc>, window_params = [{transform_indices = @transform_0, window_bounds = array<i64: 8, 32>}, {transform_indices = @transform_1, window_bounds = array<i64: 8, 8>}, {pipeline_mode = #tpu.pipeline_mode<synchronous>, transform_indices = @transform_2, window_bounds = array<i64: 32, 32>}, {pipeline_mode = #tpu.pipeline_mode<synchronous>, transform_indices = @transform_3, window_bounds = array<i64: 1, 32>}, {pipeline_mode = #tpu.pipeline_mode<synchronous>, transform_indices = @transform_4, window_bounds = array<i64: 32, 16>}, {pipeline_mode = #tpu.pipeline_mode<synchronous>, transform_indices = @transform_5, window_bounds = array<i64: 1, 16>}, {pipeline_mode = #tpu.pipeline_mode<synchronous>, transform_indices = @transform_6, window_bounds = array<i64: 8, 32>}, {pipeline_mode = #tpu.pipeline_mode<synchronous>, transform_indices = @transform_7, window_bounds = array<i64: 1, 32>}, {pipeline_mode = #tpu.pipeline_mode<synchronous>, transform_indices = @transform_8, window_bounds = array<i64: 32, 32>}, {pipeline_mode = #tpu.pipeline_mode<synchronous>, transform_indices = @transform_9, window_bounds = array<i64: 1, 32>}, {transform_indices = @transform_10, window_bounds = array<i64: 8, 56>}]} {
    %c0 = arith.constant 0 : index
    %c0_0 = arith.constant 0 : index
    %0 = vector.load %arg1[%c0, %c0_0] : memref<8x32xf32, #tpu.memory_space<vmem>>, vector<8x32xf32>
    %c0_1 = arith.constant 0 : index
    %c0_2 = arith.constant 0 : index
    %1 = vector.load %arg3[%c0_1, %c0_2] : memref<32x32xf32, #tpu.memory_space<vmem>>, vector<32x32xf32>
    %cst = arith.constant dense<0.000000e+00> : vector<8x32xf32>
    %2 = tpu.matmul %0, %1, %cst {dimension_numbers = #tpu.dot_dimension_numbers<[1], [0], [0], [1], [0, 0, 1, 1], [], []>} : vector<8x32xf32>, vector<32x32xf32>, vector<8x32xf32> -> vector<8x32xf32>
    %c0_3 = arith.constant 0 : index
    %c0_4 = arith.constant 0 : index
    %3 = vector.load %arg4[%c0_3, %c0_4] : memref<1x32xf32, #tpu.memory_space<vmem>>, vector<1x32xf32>
    %4 = vector.broadcast %3 : vector<1x32xf32> to vector<8x32xf32>
    %5 = arith.addf %2, %4 : vector<8x32xf32>
    %cst_5 = arith.constant 0.000000e+00 : f32
    %6 = vector.broadcast %cst_5 : f32 to vector<8x32xf32>
    %7 = arith.maximumf %5, %6 : vector<8x32xf32>
    %c0_6 = arith.constant 0 : index
    %c0_7 = arith.constant 0 : index
    %8 = vector.load %arg5[%c0_6, %c0_7] : memref<32x16xf32, #tpu.memory_space<vmem>>, vector<32x16xf32>
    %cst_8 = arith.constant dense<0.000000e+00> : vector<8x16xf32>
    %9 = tpu.matmul %7, %8, %cst_8 {dimension_numbers = #tpu.dot_dimension_numbers<[1], [0], [0], [1], [0, 0, 1, 1], [], []>} : vector<8x32xf32>, vector<32x16xf32>, vector<8x16xf32> -> vector<8x16xf32>
    %c0_9 = arith.constant 0 : index
    %c0_10 = arith.constant 0 : index
    %10 = vector.load %arg6[%c0_9, %c0_10] : memref<1x16xf32, #tpu.memory_space<vmem>>, vector<1x16xf32>
    %11 = vector.broadcast %10 : vector<1x16xf32> to vector<8x16xf32>
    %12 = arith.addf %9, %11 : vector<8x16xf32>
    %13 = vector.extract_strided_slice %12 {offsets = [0, 0], sizes = [8, 8], strides = [1, 1]} : vector<8x16xf32> to vector<8x8xf32>
    %14 = vector.extract_strided_slice %12 {offsets = [0, 8], sizes = [8, 8], strides = [1, 1]} : vector<8x16xf32> to vector<8x8xf32>
    %cst_11 = arith.constant 5.000000e-01 : f32
    %15 = vector.broadcast %cst_11 : f32 to vector<8x8xf32>
    %16 = arith.mulf %15, %14 : vector<8x8xf32>
    %17 = math.exp %16 : vector<8x8xf32>
    %c0_12 = arith.constant 0 : index
    %c0_13 = arith.constant 0 : index
    %18 = vector.load %arg2[%c0_12, %c0_13] : memref<8x8xf32, #tpu.memory_space<vmem>>, vector<8x8xf32>
    %19 = arith.mulf %18, %17 : vector<8x8xf32>
    %20 = arith.addf %19, %13 : vector<8x8xf32>
    %c0_14 = arith.constant 0 : index
    %c0_15 = arith.constant 0 : index
    %21 = vector.load %arg7[%c0_14, %c0_15] : memref<8x32xf32, #tpu.memory_space<vmem>>, vector<8x32xf32>
    %cst_16 = arith.constant dense<0.000000e+00> : vector<8x32xf32>
    %22 = tpu.matmul %20, %21, %cst_16 {dimension_numbers = #tpu.dot_dimension_numbers<[1], [0], [0], [1], [0, 0, 1, 1], [], []>} : vector<8x8xf32>, vector<8x32xf32>, vector<8x32xf32> -> vector<8x32xf32>
    %c0_17 = arith.constant 0 : index
    %c0_18 = arith.constant 0 : index
    %23 = vector.load %arg8[%c0_17, %c0_18] : memref<1x32xf32, #tpu.memory_space<vmem>>, vector<1x32xf32>
    %24 = vector.broadcast %23 : vector<1x32xf32> to vector<8x32xf32>
    %25 = arith.addf %22, %24 : vector<8x32xf32>
    %cst_19 = arith.constant 0.000000e+00 : f32
    %26 = vector.broadcast %cst_19 : f32 to vector<8x32xf32>
    %27 = arith.maximumf %25, %26 : vector<8x32xf32>
    %c0_20 = arith.constant 0 : index
    %c0_21 = arith.constant 0 : index
    %28 = vector.load %arg9[%c0_20, %c0_21] : memref<32x32xf32, #tpu.memory_space<vmem>>, vector<32x32xf32>
    %cst_22 = arith.constant dense<0.000000e+00> : vector<8x32xf32>
    %29 = tpu.matmul %27, %28, %cst_22 {dimension_numbers = #tpu.dot_dimension_numbers<[1], [0], [0], [1], [0, 0, 1, 1], [], []>} : vector<8x32xf32>, vector<32x32xf32>, vector<8x32xf32> -> vector<8x32xf32>
    %c0_23 = arith.constant 0 : index
    %c0_24 = arith.constant 0 : index
    %30 = vector.load %arg10[%c0_23, %c0_24] : memref<1x32xf32, #tpu.memory_space<vmem>>, vector<1x32xf32>
    %31 = vector.broadcast %30 : vector<1x32xf32> to vector<8x32xf32>
    %32 = arith.addf %29, %31 : vector<8x32xf32>
    %33 = arith.negf %32 : vector<8x32xf32>
    %34 = math.exp %33 : vector<8x32xf32>
    %cst_25 = arith.constant 1.000000e+00 : f32
    %35 = vector.broadcast %cst_25 : f32 to vector<8x32xf32>
    %36 = arith.addf %35, %34 : vector<8x32xf32>
    %37 = arith.divf %35, %36 : vector<8x32xf32>
    %38 = tpu.concatenate %37, %20, %13, %14 in 1 : vector<8x32xf32>, vector<8x8xf32>, vector<8x8xf32>, vector<8x8xf32> -> vector<8x56xf32>
    %c0_26 = arith.constant 0 : index
    %c0_27 = arith.constant 0 : index
    %39 = vector.load %arg11[%c0_26, %c0_27] : memref<8x56xf32, #tpu.memory_space<vmem>>, vector<8x56xf32>
    tpu.vector_store %arg11[%c0_26, %c0_27], %38 {strides = array<i32>} : memref<8x56xf32, #tpu.memory_space<vmem>>, vector<8x56xf32>,
    return
  }
  func.func @transform_0(%arg0: i32) -> (i32, i32) {
    %c0_i32 = arith.constant 0 : i32
    %c0_i32_0 = arith.constant 0 : i32
    return %arg0, %c0_i32 : i32, i32
  }
  func.func @transform_1(%arg0: i32) -> (i32, i32) {
    %c0_i32 = arith.constant 0 : i32
    %c0_i32_0 = arith.constant 0 : i32
    return %arg0, %c0_i32 : i32, i32
  }
  func.func @transform_2(%arg0: i32) -> (i32, i32) {
    %c0_i32 = arith.constant 0 : i32
    %c0_i32_0 = arith.constant 0 : i32
    %c0_i32_1 = arith.constant 0 : i32
    return %c0_i32, %c0_i32_0 : i32, i32
  }
  func.func @transform_3(%arg0: i32) -> (i32, i32) {
    %c0_i32 = arith.constant 0 : i32
    %c0_i32_0 = arith.constant 0 : i32
    %c0_i32_1 = arith.constant 0 : i32
    return %c0_i32, %c0_i32_0 : i32, i32
  }
  func.func @transform_4(%arg0: i32) -> (i32, i32) {
    %c0_i32 = arith.constant 0 : i32
    %c0_i32_0 = arith.constant 0 : i32
    %c0_i32_1 = arith.constant 0 : i32
    return %c0_i32, %c0_i32_0 : i32, i32
  }
  func.func @transform_5(%arg0: i32) -> (i32, i32) {
    %c0_i32 = arith.constant 0 : i32
    %c0_i32_0 = arith.constant 0 : i32
    %c0_i32_1 = arith.constant 0 : i32
    return %c0_i32, %c0_i32_0 : i32, i32
  }
  func.func @transform_6(%arg0: i32) -> (i32, i32) {
    %c0_i32 = arith.constant 0 : i32
    %c0_i32_0 = arith.constant 0 : i32
    %c0_i32_1 = arith.constant 0 : i32
    return %c0_i32, %c0_i32_0 : i32, i32
  }
  func.func @transform_7(%arg0: i32) -> (i32, i32) {
    %c0_i32 = arith.constant 0 : i32
    %c0_i32_0 = arith.constant 0 : i32
    %c0_i32_1 = arith.constant 0 : i32
    return %c0_i32, %c0_i32_0 : i32, i32
  }
  func.func @transform_8(%arg0: i32) -> (i32, i32) {
    %c0_i32 = arith.constant 0 : i32
    %c0_i32_0 = arith.constant 0 : i32
    %c0_i32_1 = arith.constant 0 : i32
    return %c0_i32, %c0_i32_0 : i32, i32
  }
  func.func @transform_9(%arg0: i32) -> (i32, i32) {
    %c0_i32 = arith.constant 0 : i32
    %c0_i32_0 = arith.constant 0 : i32
    %c0_i32_1 = arith.constant 0 : i32
    return %c0_i32, %c0_i32_0 : i32, i32
  }
  func.func @transform_10(%arg0: i32) -> (i32, i32) {
    %c0_i32 = arith.constant 0 : i32
    %c0_i32_0 = arith.constant 0 : i32
    return %arg0, %c0_i32 : i32, i32
  }
}

</mosaic_0001>

<bundles_post_ra>
// kernel: tpu_custom_call.1
= control target key start
LH: loop header
LB: loop body
LE: loop exit
PB: predicated region body
PF: predicated region fallthrough
CT: control target
= control target key end

     0   :  { %15 = vsyncpa [#allocation3], 0  ;;  %s1378_s0 = inlined_call_operand.hbm [shape: f32[16,32], index: 0, kind: input, shape index: {}]   ;;  %s1379_s1 = inlined_call_operand.vmem [shape: f32[16,8], index: 1, kind: input, shape index: {}]   ;;  %s1380_s2 = inlined_call_operand.vmem [shape: f32[32,32], index: 2, kind: input, shape index: {}]   ;;  %s1381_s3 = inlined_call_operand.vmem [shape: f32[1,32], index: 3, kind: input, shape index: {}]   ;;  %s1382_s4 = inlined_call_operand.vmem [shape: f32[32,16], index: 4, kind: input, shape index: {}]   ;;  %s1383_s5 = inlined_call_operand.vmem [shape: f32[1,16], index: 5, kind: input, shape index: {}]   ;;  %s1384_s6 = inlined_call_operand.vmem [shape: f32[8,32], index: 6, kind: input, shape index: {}]   ;;  %s1385_s7 = inlined_call_operand.vmem [shape: f32[1,32], index: 7, kind: input, shape index: {}]   ;;  %s1386_s8 = inlined_call_operand.vmem [shape: f32[32,32], index: 8, kind: input, shape index: {}]   ;;  %s1387_s9 = inlined_call_operand.vmem [shape: f32[1,32], index: 9, kind: input, shape index: {}]   ;;  %s1388_s10 = inlined_call_operand.hbm [shape: f32[16,56], index: 10, kind: output, shape index: {}]  }
   0x1   :  { %17 = vsyncpa [#allocation3 + $0x1], 0 }
   0x2   :  { %18 = vsyncpa [#allocation4], 0 }
   0x3   :  { %20 = vsyncpa [#allocation4 + $0x1], 0  ;;  %s1146_s13 = smov 0   ;;  %s1148_s14 = smov 0  }
   0x4   :  { %s1150_s15 = smov 0   ;;  %s1152_s16 = smov 0  }
   0x5 LB: > { %1394 = sst [smem:[#allocation8_spill]] %s1078_s15  ;;  %s1167_s17 = sadd.s32 4294967295, %s1082_s16   ;;  %s1082_s16 = sphi %s1152_s16, %s1408_s16   ;;  %s1078_s15 = sphi %s1150_s15, %s1410_s15   ;;  %s1074_s14 = sphi %s1148_s14, %s1412_s14   ;;  %s1070_s13 = sphi %s1146_s13, %s1411_s13  }
   0x6   : > { %s856_s18 = sadd.s32 4294967294, %s1082_s16   ;;  %s1171_s19 = sadd.s32 1, %s1082_s16  }
   0x7   : > { %1395 = sst [smem:[#allocation9_spill]] %s1171_s19  ;;  %s33_s20 = sadd.s32 1, %s1078_s15 }
   0x8   : > { %s30_s21 = ssub.s32 %s1082_s16, %s1171_s19  ;;  %p40_p0 = scmp.ne.s32.totalorder %s1078_s15, %s1074_s14 }
   0x9   : > { %p31_p1 = scmp.eq.s32.totalorder %s30_s21, 0  ;;  %p41_p2 = scmp.eq.s32.totalorder %s1082_s16, 0 }
   0xa   : > { %p46_p3 = scmp.ne.s32.totalorder %s1074_s14, %s1070_s13  ;;  %p47_p4 = scmp.eq.s32.totalorder %s1167_s17, 0 }
   0xb   : > { %s1183_s22 = scalar_select %p31_p1, %s1078_s15, %s33_s20  }
   0xc   : > { %p1185_p5 = por %p41_p2, %p40_p0  ;;  %p1189_p6 = por %p47_p4, %p46_p3 }
   0xd   : > { %1396 = sst [smem:[#allocation10_spill]] %s1183_s22  ;;  %p264_p7 = scmp.eq.s32.totalorder %s1167_s17, 1 }
   0xe   : > { %s1398_s24 = scalar_select %p1189_p6, 1, 0 }
   0xf   : > { %p270_p8 = scmp.eq.s32.totalorder %s856_s18, 1  ;;  %p945_p10 = scmp.lt.s32.totalorder %s1082_s16, 2 }
  0x10   : > { %p1196_p11 = por %p264_p7, %p40_p0  ;;  %s314_s27 = sand.u32 1, %s1078_s15  }
  0x11   : > { %p1200_p12 = por %p270_p8, %p46_p3  ;;  %s860_s28 = sshll.u32 %s1082_s16, 7 }
  0x12   : > { %s1399_s25 = scalar_select %p1196_p11, 1, 0 }
  0x13   : > { %s1400_s26 = scalar_select %p1200_p12, 1, 0 }
  0x14   : > { %s859_s29 = sshll.u32 %s314_s27, 3  ;;  %s1209_s12 = scalar_lea.hbm %s1378_s0, %s860_s28 }
  0x15   : > { %s318_s18 = scalar_lea.vmem [#allocation2], %s859_s29  ;;  %p1213_p13 = pnand %p945_p10, %p1185_p5 }
  0x16   : > { %s325_s20 = sshll.u32 %s318_s18, 4  ;;  %s315_s22 = scalar_lea.sflag [#allocation3], %s314_s27  ;;  %s1217_s20 = int_to_ptr.vmem [resolvable:$true] %s325_s20 }
  0x17   : > { %s990_s15 = scalar_lea.hbm %s1209_s12, 128  ;;  %p992_p3 = pneg %p1213_p13 }
  0x18   : > { %p991_p2 = scmp.ne.s32.totalorder %s1209_s12, %s990_s15  ;;  %s995_s23 = scalar_lea.hbm %s1378_s0, 256 }
  0x19   : > { %p996_p5 = scmp.lt.s32.totalorder %s1209_s12, %s1378_s0  ;;  %p997_p8 = scmp.lt.s32.totalorder %s995_s23, %s990_s15 }
  0x1a   : > { %p993_p4 = pnand %p992_p3, %p991_p2 }
  0x1b   : > { %p998_p10 = por %p997_p8, %p996_p5 }
  0x1c   : > { %p994_p7 = pneg %p993_p4 }
  0x1e   : > { %p999_p9 = pnand %p998_p10, %p994_p7 }
  0x20   : > { %1002 = shalt.err (!%p999_p9)
}
  0x21   : > { %s1003_s27 = scalar_lea.vmem %s1217_s20, 128  ;;  %s1084_s18 = smov [#allocation2]  }
  0x22   : > { %p1004_p0 = scmp.ne.s32.totalorder %s1217_s20, %s1003_s27  ;;  %s1008_s19 = sshll.u32 %s1084_s18, 4  ;;  %s1009_s19 = int_to_ptr.vmem [resolvable:$false] %s1008_s19 }
  0x23   : > { %s1010_s28 = scalar_lea.vmem %s1009_s19, 256  ;;  %p1011_p4 = scmp.lt.s32.totalorder %s1217_s20, %s1009_s19 }
  0x24   : > { %p1006_p1 = pnand %p1004_p0, %p992_p3  ;;  %p1012_p12 = scmp.lt.s32.totalorder %s1010_s28, %s1003_s27 }
  0x26   : > { %p1007_p2 = pneg %p1006_p1  ;;  %p1013_p11 = por %p1012_p12, %p1011_p4 }
  0x28   : > { %p1014_p6 = pnand %p1013_p11, %p1007_p2 }
  0x2a   : > { %1017 = shalt.err (!%p1014_p6)
}
  0x2b   : > { %940 = dma.hbm_to_vmem [thread:$0]  (!%p1213_p13), %s1209_s12, 128, %s1217_s20, %s315_s22  }
  0x2c   : > { %p1402_p9 = scmp.lt.s32.totalorder %s1082_s16, 3  ;;  %p1403_p7 = scmp.ge.s32.totalorder %s1082_s16, 1 }
  0x2e   : > { %p338_p0 = pnand %p1403_p7, %p1402_p9 }
  0x2f   : > { %s1244_s15 = sand.u32 (!%p338_p0), 1, %s1074_s14   ;;  %p1404_p6 = scmp.ne.s32.totalorder (!%p338_p0), %s1398_s24, 0 }
  0x30   : > { %341 = sbr.rel (%p338_p0) target bundleno = 1033 (0x409), region = 60  ;;  %s862_s19 = sshll.u32 (!%p338_p0), %s1244_s15, 3 }
  0x31   : > { %s344_s29 = scalar_lea.sflag (!%p338_p0), [#allocation3], %s1244_s15  ;;  %s347_s21 = scalar_lea.vmem (!%p338_p0), [#allocation2], %s862_s19 }
  0x35   : > { %1061 = dma.done.wait (%p1404_p6), %s344_s29, 128  }
  0x36   : > { %1063 = vsyncadd (%p1404_p6), %s344_s29, 4294967168  ;;  %v1085_v0 = vmov 0.0   ;;  %vm1086_vm0 = vmmov 0   ;;  %v396_v1 = vld [vmem:[%s1380_s2 + $0x18] sm:$0xff]  ;;  %v395_v2 = vld [vmem:[%s1380_s2 + $0x10] sm:$0xff]  ;;  %vm404_vm1 = vcmask 261120  }
  0x37   : > { %895 = vmatprep.subr.mxu0 %v1085_v0  ;;  %903 = vmatprep.mubr.msk.f32.mxu0 %vm1086_vm0, %v1085_v0  ;;  %v482_v3 = vld [vmem:[%s1382_s4 + $0x18] sm:$0xff]  ;;  %v394_v4 = vld [vmem:[%s1380_s2 + $0x8] sm:$0xff]  ;;  %v393_v5 = vld [vmem:[%s1380_s2] sm:$0xff]  ;;  %s1087_s18 = smov 40   ;;  %s1088_s22 = smov 120   ;;  %vm581_vm2 = vcmask 64512  }
  0x38   : > { %906 = vmatprep.subr.mxu1 %v1085_v0  ;;  %914 = vmatprep.mubr.msk.f32.mxu1 %vm1086_vm0, %v1085_v0  ;;  %v392_v6 = vld [vmem:[%s347_s21] sm:$0xff]  ;;  %v481_v7 = vld [vmem:[%s1382_s4 + $0x10] sm:$0xff]  ;;  %p388_p11 = scmp.lt.s32.totalorder %s1167_s17, 1  ;;  %v659_v23 = vld [vmem:[%s1386_s8 + $0x18] sm:$0xff]  ;;  %s1089_s27 = smov 32   ;;  %vm754_vm3 = vcmask 326656  }
  0x39   : > { %896 = vmatpush3.msra.mxu0 %v396_v1  ;;  %907 = vmatpush3.msra.mxu1 %v482_v3  ;;  %v480_v8 = vld [vmem:[%s1382_s4 + $0x8] sm:$0xff]  ;;  %v479_v9 = vld [vmem:[%s1382_s4] sm:$0xff]  ;;  %v658_v28 = vld [vmem:[%s1386_s8 + $0x10] sm:$0xff]  ;;  %vm756_vm4 = vcmask 392192   ;;  %vm758_vm5 = vcmask 457728   ;;  %p1405_p13 = scmp.ne.s32.totalorder %s1399_s25, 0 }
  0x3a   : > { %897 = vmatprep.subr.mxu0 %v1085_v0  ;;  %908 = vmatprep.subr.mxu1 %v1085_v0  ;;  %v865_v10 = vld [vmem:[%s1381_s3] ss:$0 sm:$0xff]  ;;  %s389_s12 = scalar_select %p388_p11, %s1167_s17, 1  ;;  %v657_v29 = vld [vmem:[%s1386_s8 + $0x8] sm:$0xff] }
  0x3b   : > { %898 = vmatpush3.msra.mxu0 %v395_v2  ;;  %909 = vmatpush3.msra.mxu1 %v481_v7  ;;  %v867_v15 = vld [vmem:[%s1383_s5] ss:$0 sm:$0xff] }
  0x3c   : > { %899 = vmatprep.subr.mxu0 %v1085_v0  ;;  %910 = vmatprep.subr.mxu1 %v1085_v0  ;;  %v573_v21 = vld [vmem:[%s1384_s6] sm:$0xff]  ;;  %s864_s23 = sshll.u32 %s389_s12, 3  ;;  %s1090_s12 = smov [#allocation5]  }
  0x3d   : > { %900 = vmatpush3.msra.mxu0 %v394_v4  ;;  %911 = vmatpush3.msra.mxu1 %v480_v8  ;;  %s391_s11 = scalar_lea.vmem %s1379_s1, %s864_s23  ;;  %v656_v30 = vld [vmem:[%s1386_s8] sm:$0xff]  ;;  %s1022_s21 = sshll.u32 %s1090_s12, 4  ;;  %s1023_s21 = int_to_ptr.vmem [resolvable:$false] %s1022_s21 }
  0x3e   : > { %901 = vmatprep.subr.mxu0 %v1085_v0  ;;  %912 = vmatprep.subr.mxu1 %v1085_v0  ;;  %v566_v24 = vld [vmem:[%s391_s11] sm:$0xff]  ;;  %s875_s11 = sshll.u32 %s1167_s17, 7  ;;  %s761_s17 = scalar_lea.sflag [#allocation4], %s1244_s15 }
  0x3f   : > { %902 = vmatpush3.msra.mxu0 %v393_v5  ;;  %913 = vmatpush3.msra.mxu1 %v479_v9  ;;  %v869_v31 = vld [vmem:[%s1385_s7] ss:$0 sm:$0xff]  ;;  %s1024_s20 = scalar_lea.vmem %s1023_s21, 256 }
  0x40   : > { %904 = vmatmul.mubr.msk.f32.vlgmr.msra.gmra.mxu0 %vm404_vm1, %v392_v6  ;;  %917 = vmatprep.subr.mxu0 %v1085_v0  ;;  %v871_v36 = vld [vmem:[%s1387_s9] ss:$0 sm:$0xff] }
  0x41   : > { %919 = vmatprep.mubr.msk.f32.mxu0 %vm1086_vm0, %v1085_v0  ;;  %922 = vmatprep.subr.mxu1 %v1085_v0 }
  0x42   : > { %918 = vmatpush3.msra.mxu0 %v573_v21 }
 0x100   : > { %v474_v11 = vpop.f32.mrf.mxu0 }
 0x101   : > { %v475_v12 = vadd.f32 %v865_v10, %v474_v11 }
 0x102   : > { %v905_v13 = vpop.f32.mrf.mxu0 }
 0x103   : > { %v478_v14 = vmax.f32 %v475_v12, 0.0 }
 0x105   : > { %915 = vmatmul.mubr.msk.f32.vlgmr.msra.gmra.mxu1 %vm404_vm1, %v478_v14 }
 0x106   : > { %930 = vmatprep.mubr.msk.f32.mxu1 %vm1086_vm0, %v1085_v0  ;;  %923 = vmatpush3.msra.mxu1 %v659_v23 }
 0x107   : > { %924 = vmatprep.subr.mxu1 %v1085_v0 }
 0x108   : > { %925 = vmatpush3.msra.mxu1 %v658_v28 }
 0x109   : > { %926 = vmatprep.subr.mxu1 %v1085_v0 }
 0x10a   : > { %927 = vmatpush3.msra.mxu1 %v657_v29 }
 0x10b   : > { %928 = vmatprep.subr.mxu1 %v1085_v0 }
 0x10c   : > { %929 = vmatpush3.msra.mxu1 %v656_v30 }
 0x1c5   : > { %v559_v16 = vpop.f32.mrf.mxu1 }
 0x1c6   : > { %v560_v17 = vadd.f32 %v867_v15, %v559_v16 }
 0x1c7   : > { %v916_v18 = vpop.f32.mrf.mxu1 }
 0x1c8   : > { %v563_v19 = vmul.f32 0.5, %v560_v17  ;;  %750 = vrot.lane.b32.xlu1 %v560_v17, %s1087_s18 }
 0x1ca   : > { %v564_v20 = vmul.f32 1.442695, %v563_v19 }
 0x1cc   : > { %984 = vpow2.f32 %v564_v20 }
 0x1d9   : > { %v985_v22 = vpop.eup %984 }
 0x1da   : > { %568 = vrot.lane.b32.xlu0 %v985_v22, %s1088_s22  ;;  %s1341_s22 = scalar_lea.hbm %s1388_s10, %s875_s11 }
 0x23a   : > { %v751_v45 = vpop.permute.xlu1 %750 }
 0x24c   : > { %v569_v25 = vpop.permute.xlu0 %568 }
 0x24d   : > { %v571_v26 = vmul.f32 %v569_v25, %v566_v24 }
 0x24f   : > { %v572_v27 = vadd.f32 %v571_v26, %v560_v17 }
 0x251   : > { %746 = vrot.lane.b32.xlu0 %v572_v27, %s1089_s27  ;;  %920 = vmatmul.mubr.msk.f32.vlgmr.msra.gmra.mxu0 %vm581_vm2, %v572_v27  ;;  %s387_s27 = scalar_lea.vmem [#allocation5], %s862_s19 }
 0x252   : > { %s774_s18 = sshll.u32 %s387_s27, 4  ;;  %s775_s18 = int_to_ptr.vmem [resolvable:$true] %s774_s18 }
 0x253   : > { %s1018_s19 = scalar_lea.vmem %s775_s18, 128  ;;  %p1025_p5 = scmp.lt.s32.totalorder %s775_s18, %s1023_s21 }
 0x254   : > { %p1019_p12 = scmp.ne.s32.totalorder %s775_s18, %s1018_s19  ;;  %p1026_p8 = scmp.lt.s32.totalorder %s1024_s20, %s1018_s19 }
 0x256   : > { %p1020_p1 = pnand %p1019_p12, %p1405_p13  ;;  %p1027_p10 = por %p1026_p8, %p1025_p5 }
 0x258   : > { %p1021_p3 = pneg %p1020_p1 }
 0x25a   : > { %p1028_p2 = pnand %p1027_p10, %p1021_p3 }
 0x2c3   : > { %v747_v44 = vpop.permute.xlu0 %746 }
 0x311   : > { %v651_v32 = vpop.f32.mrf.mxu0 }
 0x312   : > { %v652_v33 = vadd.f32 %v869_v31, %v651_v32 }
 0x313   : > { %v921_v34 = vpop.f32.mrf.mxu0 }
 0x314   : > { %v655_v35 = vmax.f32 %v652_v33, 0.0 }
 0x316   : > { %931 = vmatmul.mubr.msk.f32.vlgmr.msra.gmra.mxu1 %vm404_vm1, %v655_v35 }
 0x3d6   : > { %v736_v37 = vpop.f32.mrf.mxu1 }
 0x3d7   : > { %v737_v38 = vadd.f32 %v871_v36, %v736_v37 }
 0x3d8   : > { %v932_v39 = vpop.f32.mrf.mxu1 }
 0x3d9   : > { %v873_v40 = vmul.f32 -1.442695, %v737_v38 }
 0x3db   : > { %986 = vpow2.f32 %v873_v40 }
 0x3e8   : > { %v987_v41 = vpop.eup %986 }
 0x3e9   : > { %v743_v42 = vadd.f32 1.0, %v987_v41 }
 0x3eb   : > { %988 = vrcp.f32 %v743_v42 }
 0x3f8   : > { %v989_v43 = vpop.eup %988 }
 0x3f9   : > { %v753_v46 = vsel %vm404_vm1, %v989_v43, %v747_v44 }
 0x3fa   : > { %v755_v47 = vsel %vm754_vm3, %v753_v46, %v751_v45 }
 0x3fb   : > { %v757_v48 = vsel %vm756_vm4, %v755_v47, %v751_v45 }
 0x3fc   : > { %759 = vst.msk [vmem:[%s387_s27] sm:$0xff] %vm758_vm5, %v757_v48 }
 0x3fd   : > { %1031 = shalt.err (!%p1028_p2)
}
 0x3fe   : > { %s1032_s23 = scalar_lea.hbm %s1341_s22, 128  ;;  %s1036_s30 = scalar_lea.hbm %s1388_s10, 256 }
 0x3ff   : > { %p1033_p4 = scmp.ne.s32.totalorder %s1341_s22, %s1032_s23  ;;  %p1037_p0 = scmp.lt.s32.totalorder %s1341_s22, %s1388_s10 }
 0x400   : > { %p1038_p6 = scmp.lt.s32.totalorder %s1036_s30, %s1032_s23 }
 0x401   : > { %p1034_p9 = pnand %p1033_p4, %p1405_p13 }
 0x402   : > { %p1039_p11 = por %p1038_p6, %p1037_p0 }
 0x403   : > { %p1035_p7 = pneg %p1034_p9 }
 0x405   : > { %p1040_p12 = pnand %p1039_p11, %p1035_p7 }
 0x407   : > { %1043 = shalt.err (!%p1040_p12)
}
 0x408   : > { %935 = dma.vmem_to_hbm [thread:$0]  (%p1405_p13), %s775_s18, 128, %s1341_s22, %s761_s17  }
 0x409 PF: > { %s786_s28 = sand.u32 1, %s1070_s13   ;;  %p1406_p1 = scmp.ne.s32.totalorder %s1400_s26, 0 }
 0x40a   : > { %p1407_p3 = scmp.ge.s32.totalorder %s1082_s16, 2  ;;  %s787_s29 = scalar_lea.sflag [#allocation4], %s786_s28 }
 0x40c   : > { %p942_p5 = pnand %p1407_p3, %p1406_p1 }
 0x40e   : > { %p943_p8 = pneg %p942_p5 }
 0x410   : > { %1065 = dma.done.wait (%p943_p8), %s787_s29, 128  }
 0x411   : > { %1067 = vsyncadd (%p943_p8), %s787_s29, 4294967168  ;;  %s1408_s16 = sld [smem:[#allocation9_spill]]  ;;  %s1411_s13 = smov %s1074_s14 }
 0x412   : > { %s1409_s19 = sld [smem:[#allocation8_spill]] }
 0x413   : > { %s1410_s15 = sld [smem:[#allocation10_spill]] }
 0x417   : > { %p23_p10 = scmp.ge.s32.totalorder %s1408_s16, 4  }
 0x418   : > { %s1412_s14 = smov %s1409_s19 }
 0x419   :  { %25 = sbr.rel (!%p23_p10) target bundleno = 5 (0x5), region = 108 }
 0x41e   :  { %792 = vsyncpa [#allocation3], 1 }
 0x41f   :  { %794 = vsyncpa [#allocation3 + $0x1], 1 }
 0x420   :  { %795 = vsyncpa [#allocation4], 1 }
 0x421   :  { %797 = vsyncpa [#allocation4 + $0x1], 1 }

</bundles_post_ra>
